<compile_context>
chip_gen: v5e
topology: v5e:2x2
jax: 0.10.0
libtpu: 0.0.40
codegen_flags: <defaults>
</compile_context>

<pallas_src>
import functools

import jax
import jax.numpy as jnp
from jax.experimental import pallas as pl
from jax.experimental.pallas import tpu as pltpu


def _round_up(x, m):
    return (x + m - 1) // m * m


# ---------------------------------------------------------------------------
# Fused kernel: patch-embed matmul + LayerNorm + fc Linear + token mean-pool
#               + sensor Linear (on the last token tile of each batch).
#   patches : (B*Np, K1p) bf16   (Np tokens per batch, padded; K1p lane-padded)
#   w1,b1   : patch-embed projection to latent_feat_size D1 (padded to D1p)
#   gamma,beta : swin.backbone.norm (LayerNorm over the true D1 features)
#   w2,b2   : self.fc = Linear(latent_feat_size, img_feature_dim D2 -> D2p)
#   w_s,b_s : sensor head Linear (D2p -> NSp, lane-padded)
#   outputs : vid    (B*Np, D2p) bf16
#             sensor (B, 1, NSp) f32
#   scratch : pool_acc (1, D2p) f32  -- per-batch token-sum accumulator
# ---------------------------------------------------------------------------
def _fused_kernel(patch_ref, w1_ref, b1_ref, gamma_ref, beta_ref,
                  w2_ref, b2_ref, ws_ref, bs_ref,
                  vid_ref, sens_ref, pool_acc,
                  *, n_tokens, d1, tile_m, need_tok_mask):
    t = pl.program_id(1)                        # token-tile index ('arbitrary')
    n_tiles = pl.num_programs(1)

    x = patch_ref[...]                          # (tile_m, K1p) bf16
    h = jnp.dot(x, w1_ref[...],
                preferred_element_type=jnp.float32) + b1_ref[...]   # f32

    # LayerNorm over the true D1 latent features (D1 may be lane-padded).
    d1p = h.shape[-1]
    inv_d1 = 1.0 / d1
    mu = jnp.sum(h, axis=-1, keepdims=True) * inv_d1
    diff = h - mu
    if d1 != d1p:   # static: mask padded feature columns out of the variance
        feat_mask = jax.lax.broadcasted_iota(jnp.int32, (1, d1p), 1) < d1
        diff = jnp.where(feat_mask, diff, 0.0)
    var = jnp.sum(diff * diff, axis=-1, keepdims=True) * inv_d1
    hn = diff * jax.lax.rsqrt(var + 1e-5)
    hn = hn * gamma_ref[...] + beta_ref[...]

    out = jnp.dot(hn.astype(w2_ref.dtype), w2_ref[...],
                  preferred_element_type=jnp.float32) + b2_ref[...]  # f32
    vid_ref[...] = out.astype(vid_ref.dtype)

    # Per-batch token sum in a VMEM scratch accumulator (revisited across t).
    @pl.when(t == 0)
    def _():
        pool_acc[...] = jnp.zeros_like(pool_acc)

    if need_tok_mask:  # static: only emitted when token padding exists
        row_ids = jax.lax.broadcasted_iota(jnp.int32, (tile_m, 1), 0) + t * tile_m
        out_pool = jnp.where(row_ids < n_tokens, out, 0.0)
    else:
        out_pool = out
    pool_acc[...] += jnp.sum(out_pool, axis=0, keepdims=True)

    # Last token tile of this batch: finish the mean-pool + sensor Linear.
    @pl.when(t == n_tiles - 1)
    def _():
        pooled = pool_acc[...] * (1.0 / n_tokens)                    # (1, D2p)
        sig = jnp.dot(pooled, ws_ref[...],
                      preferred_element_type=jnp.float32) + bs_ref[...]
        sens_ref[...] = sig[None]                                    # (1,1,NSp)


def fused_signal_head(patches_flat, w1, b1, gamma, beta, w2, b2, w_s, b_s,
                      *, batch, n_tokens, d1, tile_m):
    Mp, K1p = patches_flat.shape
    D1p = w1.shape[1]
    D2p = w2.shape[1]
    NSp = w_s.shape[1]
    n_tiles = Mp // (batch * tile_m)
    grid = (batch, n_tiles)
    need_mask = (n_tokens % tile_m) != 0

    kernel = functools.partial(_fused_kernel, n_tokens=n_tokens, d1=d1,
                               tile_m=tile_m, need_tok_mask=need_mask)

    def _const(shape):
        return pl.BlockSpec(shape, lambda b, t, _s=len(shape): (0,) * _s)

    return pl.pallas_call(
        kernel,
        out_shape=(
            jax.ShapeDtypeStruct((Mp, D2p), jnp.bfloat16),       # vid features
            jax.ShapeDtypeStruct((batch, 1, NSp), jnp.float32),  # sensor out
        ),
        grid=grid,
        in_specs=[
            pl.BlockSpec((tile_m, K1p), lambda b, t: (b * n_tiles + t, 0)),
            _const((K1p, D1p)),      # w1
            _const((1, D1p)),        # b1
            _const((1, D1p)),        # gamma
            _const((1, D1p)),        # beta
            _const((D1p, D2p)),      # w2
            _const((1, D2p)),        # b2
            _const((D2p, NSp)),      # w_sensor
            _const((1, NSp)),        # b_sensor
        ],
        out_specs=(
            pl.BlockSpec((tile_m, D2p), lambda b, t: (b * n_tiles + t, 0)),
            pl.BlockSpec((1, 1, NSp), lambda b, t: (b, 0, 0)),
        ),
        scratch_shapes=[pltpu.VMEM((1, D2p), jnp.float32)],
        compiler_params=pltpu.CompilerParams(
            dimension_semantics=("parallel", "arbitrary"),
            vmem_limit_bytes=48 * 1024 * 1024,
        ),
    )(patches_flat, w1, b1, gamma, beta, w2, b2, w_s, b_s)


# ---------------------------------------------------------------------------
# Glue: im2col patch extraction (single fused transpose) + forward wrapper.
# ---------------------------------------------------------------------------
def extract_patches(images_bschw, patch_t, patch_h, patch_w):
    """images (B, S, C, H, W) -> patches (B, N, pt*ph*pw*C), N = T'*H'*W'."""
    B, S, C, H, W = images_bschw.shape
    Tp, Hp, Wp = S // patch_t, H // patch_h, W // patch_w
    x = images_bschw.reshape(B, Tp, patch_t, C, Hp, patch_h, Wp, patch_w)
    x = jnp.transpose(x, (0, 1, 4, 6, 2, 5, 7, 3))   # (B,T',H',W',pt,ph,pw,C)
    return x.reshape(B, Tp * Hp * Wp, patch_t * patch_h * patch_w * C)


def _pick_tile_m(requested, n_tokens, k1p, d2p,
                 vmem_budget_bytes=24 * 1024 * 1024):
    # Double-buffered bf16 streams per grid step: patch tile in + vid tile out.
    per_row = 2 * 2 * (k1p + d2p)
    cap = max(16, (vmem_budget_bytes // per_row) // 16 * 16)
    tm = max(16, min(requested, cap) // 16 * 16)
    if tm > n_tokens:                     # tiny inputs: single tile, 16-aligned
        tm = _round_up(n_tokens, 16)
    return tm


@functools.partial(jax.jit, static_argnames=("patch", "tile_m"))
def signal_video_transformer_forward(img_feats, params, patch=(2, 4, 4),
                                     tile_m=512):
    """Mirror of SignalVideoTransformer.forward (only_signal=True path)."""
    B, S, C, H, W = img_feats.shape
    # images.permute(0, 2, 1, 3, 4) in the PyTorch code is just an NCDHW layout
    # change for the conv backbone; our im2col handles layout explicitly.
    patches = extract_patches(img_feats, *patch)               # (B, N, K1)
    _, N, K1 = patches.shape
    D1 = params["w_patch"].shape[1]
    D2 = params["w_fc"].shape[1]
    n_sig = params["w_sensor"].shape[1]

    # Lane-pad contraction / feature dims to multiples of 128; pad the token
    # count to the tile size (masked out of the pooled mean inside the kernel).
    K1p = _round_up(K1, 128)
    D1p = _round_up(D1, 128)
    D2p = _round_up(D2, 128)
    NSp = _round_up(n_sig, 128)
    tm = _pick_tile_m(tile_m, N, K1p, D2p)
    Np = _round_up(N, tm)

    patches_p = jnp.pad(patches, ((0, 0), (0, Np - N), (0, K1p - K1)))
    patches_flat = patches_p.reshape(B * Np, K1p).astype(jnp.bfloat16)

    w1 = jnp.pad(params["w_patch"], ((0, K1p - K1), (0, D1p - D1))).astype(jnp.bfloat16)
    b1 = jnp.pad(params["b_patch"], ((0, 0), (0, D1p - D1)))
    gamma = jnp.pad(params["ln_gamma"], ((0, 0), (0, D1p - D1)))
    beta = jnp.pad(params["ln_beta"], ((0, 0), (0, D1p - D1)))
    w2 = jnp.pad(params["w_fc"], ((0, D1p - D1), (0, D2p - D2))).astype(jnp.bfloat16)
    b2 = jnp.pad(params["b_fc"], ((0, 0), (0, D2p - D2)))
    w_s = jnp.pad(params["w_sensor"], ((0, D2p - D2), (0, NSp - n_sig)))
    b_s = jnp.pad(params["b_sensor"], ((0, 0), (0, NSp - n_sig)))

    vid_pad, sens_pad = fused_signal_head(
        patches_flat, w1, b1, gamma, beta, w2, b2, w_s, b_s,
        batch=B, n_tokens=N, d1=D1, tile_m=tm)     # (B*Np,D2p), (B,1,NSp)

    vid_feats = vid_pad.reshape(B, Np, D2p)[:, :N, :D2]        # (B, N, D2) bf16
    sensor_outputs = sens_pad.reshape(B, NSp)[:, :n_sig]       # (B, n_signals)
    return sensor_outputs, vid_feats


# ---------------------------------------------------------------------------
# Deterministic parameter construction + reference check.
# ---------------------------------------------------------------------------
def make_params(key, k1, d_latent, d_img, n_signals=2):
    ks = jax.random.split(key, 6)
    scale = 0.02
    return {
        "w_patch":  scale * jax.random.normal(ks[0], (k1, d_latent), jnp.float32),
        "b_patch":  jnp.zeros((1, d_latent), jnp.float32),
        "ln_gamma": jnp.ones((1, d_latent), jnp.float32),
        "ln_beta":  jnp.zeros((1, d_latent), jnp.float32),
        "w_fc":     scale * jax.random.normal(ks[1], (d_latent, d_img), jnp.float32),
        "b_fc":     scale * jax.random.normal(ks[2], (1, d_img), jnp.float32),
        "w_sensor": scale * jax.random.normal(ks[3], (d_img, n_signals), jnp.float32),
        "b_sensor": jnp.zeros((1, n_signals), jnp.float32),
    }


def reference_forward(img_feats, params, patch=(2, 4, 4)):
    """Pure-JAX reference with the same bf16 input quantization as the kernel."""
    q = lambda a: a.astype(jnp.bfloat16).astype(jnp.float32)
    patches = extract_patches(img_feats, *patch)
    h = q(patches) @ q(params["w_patch"]) + params["b_patch"]
    mu = jnp.mean(h, -1, keepdims=True)
    var = jnp.mean((h - mu) ** 2, -1, keepdims=True)
    hn = (h - mu) * jax.lax.rsqrt(var + 1e-5)
    hn = hn * params["ln_gamma"] + params["ln_beta"]
    vid = q(hn) @ q(params["w_fc"]) + params["b_fc"]
    pooled = jnp.mean(vid, axis=1)
    return pooled @ params["w_sensor"] + params["b_sensor"], vid


if __name__ == "__main__":
    key = jax.random.PRNGKey(0)
    k_img, k_par = jax.random.split(key)

    # Small shapes consistent with the forward: video (B, S, C, H, W).
    B, S, C, H, W = 2, 4, 3, 16, 16
    patch = (2, 4, 4)                       # (pt, ph, pw)
    latent_feat_size = 128                  # swin.backbone.norm.normalized_shape[0]
    img_feature_dim = 64                    # args.img_feature_dim
    k1 = patch[0] * patch[1] * patch[2] * C

    img_feats = jax.random.normal(k_img, (B, S, C, H, W), jnp.float32)
    params = make_params(k_par, k1, latent_feat_size, img_feature_dim)

    sensor_out, vid_feats = signal_video_transformer_forward(img_feats, params,
                                                             patch=patch)
    jax.block_until_ready(sensor_out)
    jax.block_until_ready(vid_feats)

    ref_out, ref_vid = reference_forward(img_feats, params, patch=patch)
    assert vid_feats.shape == ref_vid.shape
    assert sensor_out.shape == ref_out.shape
    assert jnp.allclose(vid_feats.astype(jnp.float32), ref_vid,
                        atol=2e-2, rtol=2e-2), "vid_feats mismatch"
    assert jnp.allclose(sensor_out, ref_out, atol=5e-3, rtol=5e-2), \
        "sensor_outputs mismatch"

    print("KERNEL_OK")
</pallas_src>

<mosaic_0001>
module attributes {stable_mosaic.version = 11 : i64} {
  func.func @_fused_kernel(%arg0: i32, %arg1: i32, %arg2: memref<32x128xbf16, #tpu.memory_space<vmem>>, %arg3: memref<128x128xbf16, #tpu.memory_space<vmem>>, %arg4: memref<1x128xf32, #tpu.memory_space<vmem>>, %arg5: memref<1x128xf32, #tpu.memory_space<vmem>>, %arg6: memref<1x128xf32, #tpu.memory_space<vmem>>, %arg7: memref<128x128xbf16, #tpu.memory_space<vmem>>, %arg8: memref<1x128xf32, #tpu.memory_space<vmem>>, %arg9: memref<128x128xf32, #tpu.memory_space<vmem>>, %arg10: memref<1x128xf32, #tpu.memory_space<vmem>>, %arg11: memref<32x128xbf16, #tpu.memory_space<vmem>>, %arg12: memref<1x1x128xf32, #tpu.memory_space<vmem>>, %arg13: memref<1x128xf32, #tpu.memory_space<vmem>>) attributes {dimension_semantics = [#tpu.dimension_semantics<parallel>, #tpu.dimension_semantics<arbitrary>], iteration_bounds = array<i64: 2, 1>, scalar_prefetch = 0 : i64, scratch_operands = 1 : i64, tpu.core_type = #tpu.core_type<tc>, window_params = [{transform_indices = @transform_0, window_bounds = array<i64: 32, 128>}, {pipeline_mode = #tpu.pipeline_mode<synchronous>, transform_indices = @transform_1, window_bounds = array<i64: 128, 128>}, {pipeline_mode = #tpu.pipeline_mode<synchronous>, transform_indices = @transform_2, window_bounds = array<i64: 1, 128>}, {pipeline_mode = #tpu.pipeline_mode<synchronous>, transform_indices = @transform_3, window_bounds = array<i64: 1, 128>}, {pipeline_mode = #tpu.pipeline_mode<synchronous>, transform_indices = @transform_4, window_bounds = array<i64: 1, 128>}, {pipeline_mode = #tpu.pipeline_mode<synchronous>, transform_indices = @transform_5, window_bounds = array<i64: 128, 128>}, {pipeline_mode = #tpu.pipeline_mode<synchronous>, transform_indices = @transform_6, window_bounds = array<i64: 1, 128>}, {pipeline_mode = #tpu.pipeline_mode<synchronous>, transform_indices = @transform_7, window_bounds = array<i64: 128, 128>}, {pipeline_mode = #tpu.pipeline_mode<synchronous>, transform_indices = @transform_8, window_bounds = array<i64: 1, 128>}, {transform_indices = @transform_9, window_bounds = array<i64: 32, 128>}, {transform_indices = @transform_10, window_bounds = array<i64: 1, 1, 128>}]} {
    %c0 = arith.constant 0 : index
    %c0_0 = arith.constant 0 : index
    %0 = vector.load %arg2[%c0, %c0_0] : memref<32x128xbf16, #tpu.memory_space<vmem>>, vector<32x128xbf16>
    %c0_1 = arith.constant 0 : index
    %c0_2 = arith.constant 0 : index
    %1 = vector.load %arg3[%c0_1, %c0_2] : memref<128x128xbf16, #tpu.memory_space<vmem>>, vector<128x128xbf16>
    %cst = arith.constant dense<0.000000e+00> : vector<32x128xf32>
    %2 = tpu.matmul %0, %1, %cst {dimension_numbers = #tpu.dot_dimension_numbers<[1], [0], [0], [1], [0, 0, 1, 1], [], []>} : vector<32x128xbf16>, vector<128x128xbf16>, vector<32x128xf32> -> vector<32x128xf32>
    %c0_3 = arith.constant 0 : index
    %c0_4 = arith.constant 0 : index
    %3 = vector.load %arg4[%c0_3, %c0_4] : memref<1x128xf32, #tpu.memory_space<vmem>>, vector<1x128xf32>
    %4 = vector.broadcast %3 : vector<1x128xf32> to vector<32x128xf32>
    %5 = arith.addf %2, %4 : vector<32x128xf32>
    %cst_5 = arith.constant dense<0.000000e+00> : vector<32xf32>
    %6 = vector.multi_reduction <add>, %5, %cst_5 [1] : vector<32x128xf32> to vector<32xf32>
    %7 = vector.shape_cast %6 : vector<32xf32> to vector<32x1xf32>
    %cst_6 = arith.constant 7.812500e-03 : f32
    %8 = vector.broadcast %cst_6 : f32 to vector<32x1xf32>
    %9 = arith.mulf %7, %8 : vector<32x1xf32>
    %10 = vector.broadcast %9 : vector<32x1xf32> to vector<32x128xf32>
    %11 = arith.subf %5, %10 : vector<32x128xf32>
    %12 = arith.mulf %11, %11 : vector<32x128xf32>
    %cst_7 = arith.constant dense<0.000000e+00> : vector<32xf32>
    %13 = vector.multi_reduction <add>, %12, %cst_7 [1] : vector<32x128xf32> to vector<32xf32>
    %14 = vector.shape_cast %13 : vector<32xf32> to vector<32x1xf32>
    %cst_8 = arith.constant 7.812500e-03 : f32
    %15 = vector.broadcast %cst_8 : f32 to vector<32x1xf32>
    %16 = arith.mulf %14, %15 : vector<32x1xf32>
    %cst_9 = arith.constant 9.99999974E-6 : f32
    %17 = vector.broadcast %cst_9 : f32 to vector<32x1xf32>
    %18 = arith.addf %16, %17 : vector<32x1xf32>
    %19 = math.rsqrt %18 : vector<32x1xf32>
    %20 = vector.broadcast %19 : vector<32x1xf32> to vector<32x128xf32>
    %21 = arith.mulf %11, %20 : vector<32x128xf32>
    %c0_10 = arith.constant 0 : index
    %c0_11 = arith.constant 0 : index
    %22 = vector.load %arg5[%c0_10, %c0_11] : memref<1x128xf32, #tpu.memory_space<vmem>>, vector<1x128xf32>
    %23 = vector.broadcast %22 : vector<1x128xf32> to vector<32x128xf32>
    %24 = arith.mulf %21, %23 : vector<32x128xf32>
    %c0_12 = arith.constant 0 : index
    %c0_13 = arith.constant 0 : index
    %25 = vector.load %arg6[%c0_12, %c0_13] : memref<1x128xf32, #tpu.memory_space<vmem>>, vector<1x128xf32>
    %26 = vector.broadcast %25 : vector<1x128xf32> to vector<32x128xf32>
    %27 = arith.addf %24, %26 : vector<32x128xf32>
    %28 = arith.truncf %27 : vector<32x128xf32> to vector<32x128xbf16>
    %c0_14 = arith.constant 0 : index
    %c0_15 = arith.constant 0 : index
    %29 = vector.load %arg7[%c0_14, %c0_15] : memref<128x128xbf16, #tpu.memory_space<vmem>>, vector<128x128xbf16>
    %cst_16 = arith.constant dense<0.000000e+00> : vector<32x128xf32>
    %30 = tpu.matmul %28, %29, %cst_16 {dimension_numbers = #tpu.dot_dimension_numbers<[1], [0], [0], [1], [0, 0, 1, 1], [], []>} : vector<32x128xbf16>, vector<128x128xbf16>, vector<32x128xf32> -> vector<32x128xf32>
    %c0_17 = arith.constant 0 : index
    %c0_18 = arith.constant 0 : index
    %31 = vector.load %arg8[%c0_17, %c0_18] : memref<1x128xf32, #tpu.memory_space<vmem>>, vector<1x128xf32>
    %32 = vector.broadcast %31 : vector<1x128xf32> to vector<32x128xf32>
    %33 = arith.addf %30, %32 : vector<32x128xf32>
    %34 = arith.truncf %33 : vector<32x128xf32> to vector<32x128xbf16>
    %c0_19 = arith.constant 0 : index
    %c0_20 = arith.constant 0 : index
    %35 = vector.load %arg11[%c0_19, %c0_20] : memref<32x128xbf16, #tpu.memory_space<vmem>>, vector<32x128xbf16>
    tpu.vector_store %arg11[%c0_19, %c0_20], %34 {strides = array<i32>} : memref<32x128xbf16, #tpu.memory_space<vmem>>, vector<32x128xbf16>,
    %c0_i32 = arith.constant 0 : i32
    %36 = arith.cmpi eq, %arg1, %c0_i32 : i32
    %37 = arith.extui %36 : i1 to i32
    %c0_i32_21 = arith.constant 0 : i32
    %38 = arith.cmpi ne, %37, %c0_i32_21 : i32
    scf.if %38 {
      %cst_29 = arith.constant 0.000000e+00 : f32
      %47 = vector.broadcast %cst_29 : f32 to vector<1x128xf32>
      %c0_30 = arith.constant 0 : index
      %c0_31 = arith.constant 0 : index
      %48 = vector.load %arg13[%c0_30, %c0_31] : memref<1x128xf32, #tpu.memory_space<vmem>>, vector<1x128xf32>
      tpu.vector_store %arg13[%c0_30, %c0_31], %47 {strides = array<i32>} : memref<1x128xf32, #tpu.memory_space<vmem>>, vector<1x128xf32>,
    } else {
    }
    %c0_22 = arith.constant 0 : index
    %c0_23 = arith.constant 0 : index
    %39 = vector.load %arg13[%c0_22, %c0_23] : memref<1x128xf32, #tpu.memory_space<vmem>>, vector<1x128xf32>
    %cst_24 = arith.constant dense<0.000000e+00> : vector<128xf32>
    %40 = vector.multi_reduction <add>, %33, %cst_24 [0] : vector<32x128xf32> to vector<128xf32>
    %41 = vector.shape_cast %40 : vector<128xf32> to vector<1x128xf32>
    %42 = arith.addf %39, %41 : vector<1x128xf32>
    %c0_25 = arith.constant 0 : index
    %c0_26 = arith.constant 0 : index
    %43 = vector.load %arg13[%c0_25, %c0_26] : memref<1x128xf32, #tpu.memory_space<vmem>>, vector<1x128xf32>
    tpu.vector_store %arg13[%c0_25, %c0_26], %42 {strides = array<i32>} : memref<1x128xf32, #tpu.memory_space<vmem>>, vector<1x128xf32>,
    %c0_i32_27 = arith.constant 0 : i32
    %44 = arith.cmpi eq, %arg1, %c0_i32_27 : i32
    %45 = arith.extui %44 : i1 to i32
    %c0_i32_28 = arith.constant 0 : i32
    %46 = arith.cmpi ne, %45, %c0_i32_28 : i32
    scf.if %46 {
      %c0_29 = arith.constant 0 : index
      %c0_30 = arith.constant 0 : index
      %47 = vector.load %arg13[%c0_29, %c0_30] : memref<1x128xf32, #tpu.memory_space<vmem>>, vector<1x128xf32>
      %cst_31 = arith.constant 3.125000e-02 : f32
      %48 = vector.broadcast %cst_31 : f32 to vector<1x128xf32>
      %49 = arith.mulf %47, %48 : vector<1x128xf32>
      %c0_32 = arith.constant 0 : index
      %c0_33 = arith.constant 0 : index
      %50 = vector.load %arg9[%c0_32, %c0_33] : memref<128x128xf32, #tpu.memory_space<vmem>>, vector<128x128xf32>
      %cst_34 = arith.constant dense<0.000000e+00> : vector<1x128xf32>
      %51 = tpu.matmul %49, %50, %cst_34 {dimension_numbers = #tpu.dot_dimension_numbers<[1], [0], [0], [1], [0, 0, 1, 1], [], []>} : vector<1x128xf32>, vector<128x128xf32>, vector<1x128xf32> -> vector<1x128xf32>
      %c0_35 = arith.constant 0 : index
      %c0_36 = arith.constant 0 : index
      %52 = vector.load %arg10[%c0_35, %c0_36] : memref<1x128xf32, #tpu.memory_space<vmem>>, vector<1x128xf32>
      %53 = arith.addf %51, %52 : vector<1x128xf32>
      %54 = vector.shape_cast %53 : vector<1x128xf32> to vector<1x1x128xf32>
      %c0_37 = arith.constant 0 : index
      %c0_38 = arith.constant 0 : index
      %c0_39 = arith.constant 0 : index
      %55 = vector.load %arg12[%c0_37, %c0_38, %c0_39] : memref<1x1x128xf32, #tpu.memory_space<vmem>>, vector<1x1x128xf32>
      tpu.vector_store %arg12[%c0_37, %c0_38, %c0_39], %54 {strides = array<i32>} : memref<1x1x128xf32, #tpu.memory_space<vmem>>, vector<1x1x128xf32>,
    } else {
    }
    return
  }
  func.func @transform_0(%arg0: i32, %arg1: i32) -> (i32, i32) {
    %c1_i32 = arith.constant 1 : i32
    %0 = arith.muli %arg0, %c1_i32 : i32
    %1 = arith.addi %0, %arg1 : i32
    %c0_i32 = arith.constant 0 : i32
    %c0_i32_0 = arith.constant 0 : i32
    return %1, %c0_i32 : i32, i32
  }
  func.func @transform_1(%arg0: i32, %arg1: i32) -> (i32, i32) {
    %c0_i32 = arith.constant 0 : i32
    %c0_i32_0 = arith.constant 0 : i32
    %c0_i32_1 = arith.constant 0 : i32
    return %c0_i32, %c0_i32_0 : i32, i32
  }
  func.func @transform_2(%arg0: i32, %arg1: i32) -> (i32, i32) {
    %c0_i32 = arith.constant 0 : i32
    %c0_i32_0 = arith.constant 0 : i32
    %c0_i32_1 = arith.constant 0 : i32
    return %c0_i32, %c0_i32_0 : i32, i32
  }
  func.func @transform_3(%arg0: i32, %arg1: i32) -> (i32, i32) {
    %c0_i32 = arith.constant 0 : i32
    %c0_i32_0 = arith.constant 0 : i32
    %c0_i32_1 = arith.constant 0 : i32
    return %c0_i32, %c0_i32_0 : i32, i32
  }
  func.func @transform_4(%arg0: i32, %arg1: i32) -> (i32, i32) {
    %c0_i32 = arith.constant 0 : i32
    %c0_i32_0 = arith.constant 0 : i32
    %c0_i32_1 = arith.constant 0 : i32
    return %c0_i32, %c0_i32_0 : i32, i32
  }
  func.func @transform_5(%arg0: i32, %arg1: i32) -> (i32, i32) {
    %c0_i32 = arith.constant 0 : i32
    %c0_i32_0 = arith.constant 0 : i32
    %c0_i32_1 = arith.constant 0 : i32
    return %c0_i32, %c0_i32_0 : i32, i32
  }
  func.func @transform_6(%arg0: i32, %arg1: i32) -> (i32, i32) {
    %c0_i32 = arith.constant 0 : i32
    %c0_i32_0 = arith.constant 0 : i32
    %c0_i32_1 = arith.constant 0 : i32
    return %c0_i32, %c0_i32_0 : i32, i32
  }
  func.func @transform_7(%arg0: i32, %arg1: i32) -> (i32, i32) {
    %c0_i32 = arith.constant 0 : i32
    %c0_i32_0 = arith.constant 0 : i32
    %c0_i32_1 = arith.constant 0 : i32
    return %c0_i32, %c0_i32_0 : i32, i32
  }
  func.func @transform_8(%arg0: i32, %arg1: i32) -> (i32, i32) {
    %c0_i32 = arith.constant 0 : i32
    %c0_i32_0 = arith.constant 0 : i32
    %c0_i32_1 = arith.constant 0 : i32
    return %c0_i32, %c0_i32_0 : i32, i32
  }
  func.func @transform_9(%arg0: i32, %arg1: i32) -> (i32, i32) {
    %c1_i32 = arith.constant 1 : i32
    %0 = arith.muli %arg0, %c1_i32 : i32
    %1 = arith.addi %0, %arg1 : i32
    %c0_i32 = arith.constant 0 : i32
    %c0_i32_0 = arith.constant 0 : i32
    return %1, %c0_i32 : i32, i32
  }
  func.func @transform_10(%arg0: i32, %arg1: i32) -> (i32, i32, i32) {
    %c0_i32 = arith.constant 0 : i32
    %c0_i32_0 = arith.constant 0 : i32
    %c0_i32_1 = arith.constant 0 : i32
    return %arg0, %c0_i32, %c0_i32_0 : i32, i32, i32
  }
}

</mosaic_0001>

<bundles_post_ra>
// kernel: signal_video_transformer_forward.1
= control target key start
LH: loop header
LB: loop body
LE: loop exit
PB: predicated region body
PF: predicated region fallthrough
CT: control target
= control target key end

     0   :  { %s1502_s0 = inlined_call_operand.vmem [shape: bf16[64,128], index: 0, kind: input, shape index: {}]   ;;  %s1503_s1 = inlined_call_operand.vmem [shape: bf16[128,128], index: 1, kind: input, shape index: {}]   ;;  %s1504_s2 = inlined_call_operand.vmem [shape: f32[1,128], index: 2, kind: input, shape index: {}]   ;;  %s1505_s3 = inlined_call_operand.vmem [shape: f32[1,128], index: 3, kind: input, shape index: {}]   ;;  %s1506_s4 = inlined_call_operand.vmem [shape: f32[1,128], index: 4, kind: input, shape index: {}]   ;;  %s1507_s5 = inlined_call_operand.vmem [shape: bf16[128,128], index: 5, kind: input, shape index: {}]   ;;  %s1508_s6 = inlined_call_operand.vmem [shape: f32[1,128], index: 6, kind: input, shape index: {}]   ;;  %s1509_s7 = inlined_call_operand.vmem [shape: f32[128,128], index: 7, kind: input, shape index: {}]   ;;  %s1510_s8 = inlined_call_operand.vmem [shape: f32[1,128], index: 8, kind: input, shape index: {}]   ;;  %s1511_s9 = inlined_call_operand.hbm [shape: bf16[64,128], index: 9, kind: output, shape index: {0}]   ;;  %s1512_s10 = inlined_call_operand.hbm [shape: f32[2,1,128], index: 10, kind: output, shape index: {1}]  }
   0x1   :  { %1514 = sst [smem:[#allocation10_spill]] %s1502_s0 }
   0x2   :  { %1515 = sst [smem:[#allocation11_spill]] %s1503_s1 }
   0x3   :  { %1516 = sst [smem:[#allocation12_spill]] %s1504_s2 }
   0x4   :  { %1517 = sst [smem:[#allocation13_spill]] %s1505_s3 }
   0x5   :  { %1518 = sst [smem:[#allocation14_spill]] %s1506_s4 }
   0x6   :  { %16 = vsyncpa [#allocation4], 0 }
   0x7   :  { %18 = vsyncpa [#allocation4 + $0x1], 0 }
   0x8   :  { %19 = vsyncpa [#allocation6], 0 }
   0x9   :  { %21 = vsyncpa [#allocation6 + $0x1], 0  ;;  %s1250_s13 = smov 0   ;;  %s1252_s14 = smov 0  }
   0xa   :  { %s1254_s15 = smov 0   ;;  %s1256_s16 = smov 0  }
   0xb   :  { %s1258_s17 = smov 0   ;;  %s1260_s18 = smov 0  }
   0xc LB: > { %s882_s19 = sadd.s32 4294967295, %s1190_s18   ;;  %s883_s20 = sadd.s32 4294967294, %s1190_s18   ;;  %s1190_s18 = sphi %s1260_s18, %s27_s18   ;;  %s1186_s17 = sphi %s1258_s17, %s1532_s17   ;;  %s1182_s16 = sphi %s1256_s16, %s1531_s16   ;;  %s1178_s15 = sphi %s1254_s15, %s1530_s15   ;;  %s1174_s14 = sphi %s1252_s14, %s1529_s14   ;;  %s1170_s13 = sphi %s1250_s13, %s1528_s13  }
   0xd   : > { %s39_s21 = sadd.s32 1, %s1186_s17  ;;  %s244_s22 = sadd.s32 1, %s1178_s15 }
   0xe   : > { %p41_p0 = scmp.ge.s32.totalorder %s39_s21, 2  ;;  %p254_p1 = scmp.ne.s32.totalorder %s1178_s15, %s1174_s14 }
   0xf   : > { %p255_p2 = scmp.eq.s32.totalorder %s882_s19, 1  ;;  %p260_p3 = scmp.ne.s32.totalorder %s1174_s14, %s1170_s13 }
  0x10   : > { %s1534_s21 = smov (%p41_p0, %s39_s21), 0  ;;  %p261_p5 = scmp.eq.s32.totalorder %s883_s20, 1 }
  0x11   : > { %1519 = sst [smem:[#allocation9_spill]] %s1534_s21  ;;  %p1290_p4 = por %p255_p2, %p254_p1 }
  0x12   : > { %s241_s24 = ssub.s32 %s1186_s17, %s1534_s21  ;;  %p886_p6 = scmp.ge.s32.totalorder %s1190_s18, 1 }
  0x13   : > { %p242_p7 = scmp.eq.s32.totalorder %s241_s24, 0  ;;  %p1297_p8 = por %p261_p5, %p260_p3 }
  0x14   : > { %p340_p9 = scmp.lt.s32.totalorder %s1190_s18, 3 }
  0x15   : > { %s1303_s26 = scalar_select %p242_p7, %s1178_s15, %s244_s22  }
  0x16   : > { %p341_p10 = pnand %p886_p6, %p340_p9 }
  0x17   : > { %s1522_s1 = sld [smem:[#allocation11_spill]] (!%p341_p10)  ;;  %s888_s22 = sshll.u32 (!%p341_p10), %s1182_s16, 2 }
  0x18   : > { %344 = sbr.rel (%p341_p10) target bundleno = 780 (0x30c), region = 56  ;;  %p385_p11 = scmp.lt.s32.totalorder (!%p341_p10), %s888_s22, 7 }
  0x19   : > { %s1523_s0 = sld [smem:[#allocation10_spill]] (!%p341_p10)  ;;  %s1411_s11 = sand.u32 (!%p341_p10), 1, %s1174_s14  }
  0x1a   : > { %s1524_s2 = sld [smem:[#allocation12_spill]] (!%p341_p10)  ;;  %s887_s27 = sshll.u32 (!%p341_p10), %s1411_s11, 4 }
  0x1b   : > { %s1525_s3 = sld [smem:[#allocation13_spill]] (!%p341_p10)  ;;  %s1432_s24 = scalar_lea.vmem (!%p341_p10), [#allocation3], %s887_s27 }
  0x1c   : > { %s1526_s4 = sld [smem:[#allocation14_spill]] (!%p341_p10)  ;;  %s767_s27 = sshll.u32 (!%p341_p10), %s1432_s24, 4  ;;  %s768_s27 = int_to_ptr.vmem [resolvable:$true] %s767_s27 }
  0x1d   : > { %v976_v0 = vld [vmem:[%s1522_s1 + $0x38] sm:$0xff]  ;;  %v975_v1 = vld [vmem:[%s1522_s1 + $0x30] sm:$0xff]  ;;  %v974_v2 = vld [vmem:[%s1522_s1 + $0x28] sm:$0xff]  ;;  %s1536_s22 = smov (!%p385_p11, %s888_s22), 7  ;;  %s985_s19 = sshll.u32 %s1182_s16, 4 }
  0x1e   : > { %477 = vmatpush.bf16.msra.mxu0 %v976_v0  ;;  %997 = vmatpush.bf16.msra.mxu3 %v976_v0  ;;  %v973_v3 = vld [vmem:[%s1522_s1 + $0x20] sm:$0xff]  ;;  %v972_v4 = vld [vmem:[%s1522_s1 + $0x18] sm:$0xff]  ;;  %v971_v5 = vld [vmem:[%s1522_s1 + $0x10] sm:$0xff]  ;;  %s889_s12 = sshll.u32 %s1536_s22, 2  ;;  %s766_s29 = scalar_lea.hbm %s1511_s9, %s985_s19 }
  0x1f   : > { %v970_v6 = vld [vmem:[%s1522_s1 + $0x8] sm:$0xff]  ;;  %v969_v7 = vld [vmem:[%s1522_s1] sm:$0xff]  ;;  %s388_s21 = scalar_lea.vmem %s1523_s0, %s889_s12  ;;  %v984_v35 = vld [vmem:[%s1507_s5 + $0x38] sm:$0xff]  ;;  %s750_s22 = scalar_lea.sflag [#allocation4], %s1411_s11 }
  0x20   : > { %v967_v8 = vld [vmem:[%s388_s21] sm:$0xff]  ;;  %v968_v9 = vld [vmem:[%s388_s21 + $0x8] sm:$0xff]  ;;  %662 = vmatpush.bf16.msra.mxu1 %v984_v35  ;;  %v983_v36 = vld [vmem:[%s1507_s5 + $0x30] sm:$0xff]  ;;  %s769_s21 = sshll.u32 %s766_s29, 4  ;;  %s770_s21 = int_to_ptr.hbm [resolvable:$true] %s769_s21 }
  0x21   : > { %v1068_v10 = vld [vmem:[%s1524_s2] ss:$0 sm:$0xff]  ;;  %v982_v37 = vld [vmem:[%s1507_s5 + $0x28] sm:$0xff]  ;;  %v980_v39 = vld [vmem:[%s1507_s5 + $0x18] sm:$0xff]  ;;  %s1094_s30 = sshra.s32 %s770_s21, 4  ;;  %s1095_s30 = int_to_ptr.hbm [resolvable:$true] %s1094_s30 }
  0x22   : > { %478 = vmatpush.bf16.msra.mxu0 %v975_v1  ;;  %998 = vmatpush.bf16.msra.mxu3 %v975_v1  ;;  %v981_v38 = vld [vmem:[%s1507_s5 + $0x20] sm:$0xff]  ;;  %v979_v40 = vld [vmem:[%s1507_s5 + $0x10] sm:$0xff]  ;;  %v978_v41 = vld [vmem:[%s1507_s5 + $0x8] sm:$0xff]  ;;  %s1096_s12 = scalar_lea.hbm %s1095_s30, 16  ;;  %p1101_p1 = scmp.lt.s32.totalorder %s1095_s30, %s1511_s9 }
  0x23   : > { %v977_v44 = vld [vmem:[%s1507_s5] sm:$0xff]  ;;  %p1097_p12 = scmp.ne.s32.totalorder %s1095_s30, %s1096_s12 }
  0x24   : > { %663 = vmatpush.bf16.msra.mxu1 %v983_v36 }
  0x25   : > { %p1098_p13 = pnand %p1097_p12, %p1290_p4 }
  0x26   : > { %479 = vmatpush.bf16.msra.mxu0 %v974_v2  ;;  %999 = vmatpush.bf16.msra.mxu3 %v974_v2 }
  0x27   : > { %p1099_p0 = pneg %p1098_p13 }
  0x28   : > { %664 = vmatpush.bf16.msra.mxu1 %v982_v37  ;;  %v726_v37 = vld [vmem:[%s1509_s7 + $0x78] sm:$0xff] }
  0x29   : > { %728 = vmatpush.msra.mxu2 %v726_v37 }
  0x2a   : > { %480 = vmatpush.bf16.msra.mxu0 %v973_v3  ;;  %1000 = vmatpush.bf16.msra.mxu3 %v973_v3 }
  0x2c   : > { %665 = vmatpush.bf16.msra.mxu1 %v981_v38  ;;  %v725_v38 = vld [vmem:[%s1509_s7 + $0x70] sm:$0xff] }
  0x2d   : > { %729 = vmatpush.msra.mxu2 %v725_v38 }
  0x2e   : > { %481 = vmatpush.bf16.msra.mxu0 %v972_v4  ;;  %1001 = vmatpush.bf16.msra.mxu3 %v972_v4 }
  0x30   : > { %666 = vmatpush.bf16.msra.mxu1 %v980_v39  ;;  %v722_v39 = vld [vmem:[%s1509_s7 + $0x58] sm:$0xff] }
  0x32   : > { %482 = vmatpush.bf16.msra.mxu0 %v971_v5  ;;  %1002 = vmatpush.bf16.msra.mxu3 %v971_v5 }
  0x34   : > { %667 = vmatpush.bf16.msra.mxu1 %v979_v40  ;;  %v1192_v40 = vmov 0.0  }
  0x35   : > { %693 = vst [vmem:[#allocation2] sm:$0x1] %v1192_v40 }
  0x36   : > { %483 = vmatpush.bf16.msra.mxu0 %v970_v6  ;;  %1003 = vmatpush.bf16.msra.mxu3 %v970_v6 }
  0x38   : > { %668 = vmatpush.bf16.msra.mxu1 %v978_v41  ;;  %v721_v41 = vld [vmem:[%s1509_s7 + $0x50] sm:$0xff] }
  0x3a   : > { %484 = vmatpush.bf16.msra.mxu0 %v969_v7  ;;  %1004 = vmatpush.bf16.msra.mxu3 %v969_v7 }
  0x3c   : > { %669 = vmatpush.bf16.msra.mxu1 %v977_v44  ;;  %v719_v44 = vld [vmem:[%s1509_s7 + $0x40] sm:$0xff] }
  0x3d   : > { %485 = vmatmul.bf16.vlgmr.msra.gmra.mxu0 %v967_v8  ;;  %490 = vmatmul.bf16.vlgmr.msra.gmra.mxu3 %v968_v9  ;;  %v1069_v9 = vld [vmem:[%s1525_s3] ss:$0 sm:$0xff] }
  0xba   : > { %v486_v11 = vpop.f32.mrf.mxu0 }
  0xbb   : > { %v487_v12 = vadd.f32 %v1068_v10, %v486_v11 }
  0xbd   : > { %496 = vadd.xlane.f32.xlu0 %v487_v12 }
  0xc0   : > { %v491_v13 = vpop.f32.mrf.mxu3 }
  0xc1   : > { %v492_v14 = vadd.f32 %v1068_v10, %v491_v13 }
  0xc2   : > { %v488_v15 = vpop.f32.mrf.mxu0 }
  0xc3   : > { %v489_v16 = vadd.f32 %v1068_v10, %v488_v15  ;;  %500 = vadd.xlane.f32.xlu1 %v492_v14 }
  0xc5   : > { %498 = vadd.xlane.f32.xlu0 %v489_v16 }
  0xc8   : > { %v493_v17 = vpop.f32.mrf.mxu3 }
  0xc9   : > { %v494_v18 = vadd.f32 %v1068_v10, %v493_v17  ;;  %v1070_v17 = vld [vmem:[%s1526_s4] ss:$0 sm:$0xff] }
  0xcb   : > { %502 = vadd.xlane.f32.xlu1 %v494_v18 }
 0x130   : > { %v497_v19 = vpop.xlane.xlu0 %496 }
 0x131   : > { %v504_v20 = vmul.f32 0.0078125, %v497_v19 }
 0x133   : > { %v1336_v21 = vsub.f32 %v487_v12, %v504_v20 }
 0x135   : > { %v512_v22 = vmul.f32 %v1336_v21, %v1336_v21 }
 0x136   : > { %v501_v23 = vpop.xlane.xlu1 %500 }
 0x137   : > { %v506_v24 = vmul.f32 0.0078125, %v501_v23  ;;  %516 = vadd.xlane.f32.xlu2 %v512_v22 }
 0x138   : > { %v499_v25 = vpop.xlane.xlu0 %498 }
 0x139   : > { %v1340_v26 = vsub.f32 %v492_v14, %v506_v24  ;;  %v505_v27 = vmul.f32 0.0078125, %v499_v25 }
 0x13b   : > { %v1342_v28 = vsub.f32 %v489_v16, %v505_v27  ;;  %v514_v29 = vmul.f32 %v1340_v26, %v1340_v26 }
 0x13d   : > { %520 = vadd.xlane.f32.xlu0 %v514_v29  ;;  %v513_v30 = vmul.f32 %v1342_v28, %v1342_v28 }
 0x13e   : > { %v503_v31 = vpop.xlane.xlu1 %502 }
 0x13f   : > { %v507_v32 = vmul.f32 0.0078125, %v503_v31  ;;  %518 = vadd.xlane.f32.xlu2 %v513_v30 }
 0x141   : > { %v1348_v33 = vsub.f32 %v494_v18, %v507_v32 }
 0x143   : > { %v515_v34 = vmul.f32 %v1348_v33, %v1348_v33 }
 0x145   : > { %522 = vadd.xlane.f32.xlu1 %v515_v34 }
 0x1aa   : > { %v517_v42 = vpop.xlane.xlu2 %516 }
 0x1ab   : > { %v524_v43 = vmul.f32 0.0078125, %v517_v42 }
 0x1ad   : > { %v528_v45 = vadd.f32 1e-05, %v524_v43  ;;  %v720_v43 = vld [vmem:[%s1509_s7 + $0x48] sm:$0xff] }
 0x1af   : > { %1072 = vrsqrt.f32 %v528_v45  ;;  %vm538_vm1 = vweird.f32 %v528_v45 }
 0x1b0   : > { %v521_v46 = vpop.xlane.xlu0 %520 }
 0x1b1   : > { %v526_v47 = vmul.f32 0.0078125, %v521_v46  ;;  %v718_v46 = vld [vmem:[%s1509_s7 + $0x38] sm:$0xff] }
 0x1b2   : > { %v519_v48 = vpop.xlane.xlu2 %518 }
 0x1b3   : > { %v530_v49 = vadd.f32 1e-05, %v526_v47  ;;  %v525_v50 = vmul.f32 0.0078125, %v519_v48  ;;  %v717_v47 = vld [vmem:[%s1509_s7 + $0x30] sm:$0xff] }
 0x1b5   : > { %v1073_v51 = vpop.eup %1072  ;;  %1074 = vrsqrt.f32 %v530_v49  ;;  %v529_v52 = vadd.f32 1e-05, %v525_v50  ;;  %vm558_vm10 = vweird.f32 %v530_v49 }
 0x1b6   : > { %v533_v53 = vmul.f32 %v1073_v51, %v528_v45  ;;  %vm539_vm0 = vweird.f32 %v1073_v51  ;;  %v1071_v45 = vld [vmem:[%s1508_s6] ss:$0 sm:$0xff] }
 0x1b7   : > { %1076 = vrsqrt.f32 %v529_v52  ;;  %vm540_vm2 = vmor %vm538_vm1, %vm539_vm0  ;;  %vm548_vm4 = vweird.f32 %v529_v52 }
 0x1b8   : > { %v534_v54 = vmul.f32 %v1073_v51, %v533_v53  ;;  %v523_v55 = vpop.xlane.xlu1 %522  ;;  %v715_v53 = vld [vmem:[%s1509_s7 + $0x20] sm:$0xff] }
 0x1b9   : > { %v527_v56 = vmul.f32 0.0078125, %v523_v55  ;;  %v713_v55 = vld [vmem:[%s1509_s7 + $0x10] sm:$0xff] }
 0x1ba   : > { %v535_v57 = vmul.f32 0.5, %v534_v54  ;;  %v714_v54 = vld [vmem:[%s1509_s7 + $0x18] sm:$0xff] }
 0x1bb   : > { %v1075_v58 = vpop.eup %1074  ;;  %v531_v59 = vadd.f32 1e-05, %v527_v56  ;;  %v712_v56 = vld [vmem:[%s1509_s7 + $0x8] sm:$0xff] }
 0x1bc   : > { %v536_v60 = vsub.f32 1.5, %v535_v57  ;;  %v553_v63 = vmul.f32 %v1075_v58, %v530_v49  ;;  %vm559_vm7 = vweird.f32 %v1075_v58 }
 0x1bd   : > { %v1077_v61 = vpop.eup %1076  ;;  %1078 = vrsqrt.f32 %v531_v59  ;;  %vm568_vm8 = vweird.f32 %v531_v59  ;;  %vm560_vm11 = vmor %vm558_vm10, %vm559_vm7 }
 0x1be   : > { %v537_v62 = vmul.f32 %v1073_v51, %v536_v60  ;;  %v543_v0 = vmul.f32 %v1077_v61, %v529_v52  ;;  %v554_v2 = vmul.f32 %v1075_v58, %v553_v63  ;;  %vm549_vm3 = vweird.f32 %v1077_v61 }
 0x1bf   : > { %vm550_vm5 = vmor %vm548_vm4, %vm549_vm3 }
 0x1c0   : > { %v544_v1 = vmul.f32 %v1077_v61, %v543_v0  ;;  %v541_v4 = vsel %vm540_vm2, %v1073_v51, %v537_v62  ;;  %v555_v10 = vmul.f32 0.5, %v554_v2  ;;  %v716_v51 = vld [vmem:[%s1509_s7 + $0x28] sm:$0xff] }
 0x1c1   : > { %v572_v8 = vmul.f32 %v541_v4, %v1336_v21 }
 0x1c2   : > { %v545_v3 = vmul.f32 0.5, %v544_v1  ;;  %v556_v18 = vsub.f32 1.5, %v555_v10 }
 0x1c3   : > { %v1079_v5 = vpop.eup %1078  ;;  %v580_v16 = vmul.f32 %v1069_v9, %v572_v8 }
 0x1c4   : > { %v546_v6 = vsub.f32 1.5, %v545_v3  ;;  %v563_v7 = vmul.f32 %v1079_v5, %v531_v59  ;;  %vm569_vm6 = vweird.f32 %v1079_v5  ;;  %v557_v24 = vmul.f32 %v1075_v58, %v556_v18 }
 0x1c5   : > { %v588_v22 = vadd.f32 %v1070_v17, %v580_v16  ;;  %vm570_vm9 = vmor %vm568_vm8, %vm569_vm6 }
 0x1c6   : > { %v547_v11 = vmul.f32 %v1077_v61, %v546_v6  ;;  %v564_v12 = vmul.f32 %v1079_v5, %v563_v7  ;;  %v694_v7 = vld [vmem:[#allocation2] sm:$0x1] }
 0x1c8   : > { %v551_v13 = vsel %vm550_vm5, %v1077_v61, %v547_v11  ;;  %v565_v14 = vmul.f32 0.5, %v564_v12 }
 0x1c9   : > { %v573_v15 = vmul.f32 %v551_v13, %v1342_v28  ;;  %v561_v28 = vsel %vm560_vm11, %v1075_v58, %v557_v24  ;;  %v711_v58 = vld [vmem:[%s1509_s7] sm:$0xff] }
 0x1ca   : > { %v566_v19 = vsub.f32 1.5, %v565_v14  ;;  %v574_v30 = vmul.f32 %v561_v28, %v1340_v26  ;;  %v724_v26 = vld [vmem:[%s1509_s7 + $0x68] sm:$0xff] }
 0x1cb   : > { %v581_v20 = vmul.f32 %v1069_v9, %v573_v15  ;;  %730 = vmatpush.msra.mxu2 %v724_v26 }
 0x1cc   : > { %v567_v21 = vmul.f32 %v1079_v5, %v566_v19  ;;  %v582_v32 = vmul.f32 %v1069_v9, %v574_v30 }
 0x1cd   : > { %v589_v23 = vadd.f32 %v1070_v17, %v581_v20 }
 0x1ce   : > { %v571_v27 = vsel %vm570_vm9, %v1079_v5, %v567_v21  ;;  %v590_v35 = vadd.f32 %v1070_v17, %v582_v32 }
 0x1cf   : > { %v592_v25 = vpack.c.bf16 %v589_v23, %v588_v22  ;;  %v575_v29 = vmul.f32 %v571_v27, %v1348_v33  ;;  %v723_v33 = vld [vmem:[%s1509_s7 + $0x60] sm:$0xff] }
 0x1d0   : > { %731 = vmatpush.msra.mxu2 %v723_v33 }
 0x1d1   : > { %670 = vmatmul.bf16.vlgmr.msra.gmra.mxu1 %v592_v25  ;;  %v583_v31 = vmul.f32 %v1069_v9, %v575_v29 }
 0x1d2   : > { %732 = vmatpush.msra.mxu2 %v722_v39 }
 0x1d3   : > { %v591_v34 = vadd.f32 %v1070_v17, %v583_v31 }
 0x1d4   : > { %733 = vmatpush.msra.mxu2 %v721_v41 }
 0x1d5   : > { %v593_v36 = vpack.c.bf16 %v591_v34, %v590_v35 }
 0x1d6   : > { %734 = vmatpush.msra.mxu2 %v720_v43 }
 0x1d8   : > { %735 = vmatpush.msra.mxu2 %v719_v44 }
 0x1da   : > { %736 = vmatpush.msra.mxu2 %v718_v46 }
 0x1dc   : > { %737 = vmatpush.msra.mxu2 %v717_v47 }
 0x1de   : > { %738 = vmatpush.msra.mxu2 %v716_v51 }
 0x1e0   : > { %739 = vmatpush.msra.mxu2 %v715_v53 }
 0x1e1   : > { %675 = vmatmul.bf16.gmra.mxu1 %v593_v36 }
 0x1e2   : > { %740 = vmatpush.msra.mxu2 %v714_v54 }
 0x1e4   : > { %741 = vmatpush.msra.mxu2 %v713_v55 }
 0x1e6   : > { %742 = vmatpush.msra.mxu2 %v712_v56 }
 0x1e8   : > { %743 = vmatpush.msra.mxu2 %v711_v58 }
 0x24e   : > { %v671_v42 = vpop.f32.mrf.mxu1 }
 0x24f   : > { %v672_v49 = vadd.f32 %v1071_v45, %v671_v42 }
 0x256   : > { %v673_v48 = vpop.f32.mrf.mxu1 }
 0x257   : > { %v674_v50 = vadd.f32 %v1071_v45, %v673_v48 }
 0x259   : > { %v989_v52 = vpack.c.bf16 %v674_v50, %v672_v49  ;;  %v695_v60 = vadd.f32 %v674_v50, %v672_v49 }
 0x25b   : > { %990 = vst [vmem:[%s1432_s24] sm:$0xff] %v989_v52  }
 0x25e   : > { %v676_v57 = vpop.f32.mrf.mxu1 }
 0x25f   : > { %v677_v59 = vadd.f32 %v1071_v45, %v676_v57 }
 0x261   : > { %v696_v62 = vadd.f32 %v695_v60, %v677_v59 }
 0x266   : > { %v678_v61 = vpop.f32.mrf.mxu1 }
 0x267   : > { %v679_v63 = vadd.f32 %v1071_v45, %v678_v61 }
 0x269   : > { %v994_v0 = vpack.c.bf16 %v679_v63, %v677_v59  ;;  %v697_v1 = vadd.f32 %v696_v62, %v679_v63 }
 0x26b   : > { %996 = vst [vmem:[%s1432_s24 + $0x8] sm:$0xff] %v994_v0   ;;  %v698_v2 = vrot.slane %v697_v1, 4  ;;  %s1100_s24 = scalar_lea.hbm %s1511_s9, 32 }
 0x26c   : > { %p1102_p2 = scmp.lt.s32.totalorder %s1100_s24, %s1096_s12 }
 0x26d   : > { %v699_v3 = vadd.f32 %v698_v2, %v697_v1 }
 0x26e   : > { %p1103_p3 = por %p1102_p2, %p1101_p1 }
 0x26f   : > { %v700_v4 = vrot.slane %v699_v3, 2 }
 0x270   : > { %p1104_p5 = pnand %p1103_p3, %p1099_p0 }
 0x271   : > { %v701_v5 = vadd.f32 %v700_v4, %v699_v3 }
 0x273   : > { %v702_v6 = vrot.slane %v701_v5, 1 }
 0x275   : > { %v703_v8 = vadd.f32 %v702_v6, %v701_v5 }
 0x277   : > { %v704_v9 = vadd.f32 %v703_v8, %v694_v7 }
 0x279   : > { %705 = vst [vmem:[#allocation2] sm:$0x1] %v704_v9 }
 0x280   : > { %v709_v10 = vld [vmem:[#allocation2] sm:$0x1] }
 0x281   : > { %v710_v11 = vmul.f32 0.03125, %v709_v10 }
 0x283   : > { %744 = vmatmul.f32.vlgmr.msra.gmra.mxu2 %v710_v11 }
 0x284   : > { %1107 = shalt.err (!%p1104_p5)
}
 0x285   : > { %s1193_s19 = smov 64   ;;  %s1194_s20 = smov 4   ;;  %v727_v12 = vld [vmem:[%s1510_s8] sm:$0x1] }
 0x286   : > { %1005 = dma.vmem_to_hbm [thread:$0]  (%p1290_p4), %s768_s27, 256, %s770_s21, %s750_s22, %s1193_s19, %s1193_s19, %s1194_s20  }
 0x287   : > { %s781_s0 = scalar_lea.hbm %s1512_s10, %s1182_s16  ;;  %s382_s3 = scalar_lea.vmem [#allocation5], %s1411_s11 }
 0x288   : > { %s783_s30 = sshll.u32 %s382_s3, 4  ;;  %s785_s12 = sshll.u32 %s781_s0, 4  ;;  %s784_s30 = int_to_ptr.vmem [resolvable:$true] %s783_s30  ;;  %s786_s12 = int_to_ptr.hbm [resolvable:$true] %s785_s12 }
 0x289   : > { %s755_s24 = scalar_lea.sflag [#allocation6], %s1411_s11  ;;  %s1122_s4 = sshra.s32 %s786_s12, 4  ;;  %s1123_s4 = int_to_ptr.hbm [resolvable:$true] %s1122_s4 }
 0x28a   : > { %s1124_s27 = scalar_lea.hbm %s1123_s4, 1  ;;  %s1128_s22 = scalar_lea.hbm %s1512_s10, 2 }
 0x28b   : > { %p1125_p6 = scmp.ne.s32.totalorder %s1123_s4, %s1124_s27  ;;  %p1129_p10 = scmp.lt.s32.totalorder %s1123_s4, %s1512_s10 }
 0x28c   : > { %p1130_p11 = scmp.lt.s32.totalorder %s1128_s22, %s1124_s27 }
 0x28d   : > { %p1126_p7 = pnand %p1125_p6, %p1290_p4 }
 0x28e   : > { %p1131_p12 = por %p1130_p11, %p1129_p10 }
 0x28f   : > { %p1127_p9 = pneg %p1126_p7 }
 0x291   : > { %p1132_p13 = pnand %p1131_p12, %p1127_p9 }
 0x306   : > { %v745_v13 = vpop.f32.mrf.mxu2 }
 0x307   : > { %v746_v14 = vadd.f32 %v745_v13, %v727_v12 }
 0x309   : > { %748 = vst [vmem:[%s382_s3] sm:$0x1] %v746_v14 }
 0x30a   : > { %1135 = shalt.err (!%p1132_p13)
}
 0x30b   : > { %1006 = dma.vmem_to_hbm [thread:$0]  (%p1290_p4), %s784_s30, 16, %s786_s12, %s755_s24  }
 0x30c PF: > { %p1016_p0 = scmp.ge.s32.totalorder %s1190_s18, 2  ;;  %s797_s11 = sand.u32 1, %s1170_s13  }
 0x30d   : > { %s798_s28 = scalar_lea.sflag [#allocation4], %s797_s11 }
 0x30e   : > { %p1010_p1 = pnand %p1016_p0, %p1297_p8 }
 0x310   : > { %p1011_p2 = pneg %p1010_p1 }
 0x312   : > { %1161 = dma.done.wait (%p1011_p2), %s798_s28, 256  }
 0x313   : > { %1163 = vsyncadd (%p1011_p2), %s798_s28, 4294967040  ;;  %s808_s4 = scalar_lea.sflag [#allocation6], %s797_s11 }
 0x314   : > { %1165 = dma.done.wait (%p1011_p2), %s808_s4, 16  }
 0x315   : > { %1167 = vsyncadd (%p1011_p2), %s808_s4, 4294967280  ;;  %s27_s18 = sadd.s32 1, %s1190_s18   ;;  %s1527_s23 = sld [smem:[#allocation9_spill]] }
 0x316   : > { %p24_p3 = scmp.ge.s32.totalorder %s27_s18, 4   ;;  %s1528_s13 = smov %s1174_s14 }
 0x317   : > { %s1529_s14 = smov %s1178_s15  ;;  %s1530_s15 = smov %s1303_s26 }
 0x318   : > { %s1531_s16 = smov %s1186_s17  ;;  %26 = sbr.rel (!%p24_p3) target bundleno = 12 (0xc), region = 116 }
 0x31b   : > { %s1532_s17 = smov %s1527_s23 }
 0x31d   :  { %813 = vsyncpa [#allocation4], 1 }
 0x31e   :  { %815 = vsyncpa [#allocation4 + $0x1], 1 }
 0x31f   :  { %816 = vsyncpa [#allocation6], 1 }
 0x320   :  { %818 = vsyncpa [#allocation6 + $0x1], 1 }

</bundles_post_ra>
